<compile_context>
chip_gen: v6e
topology: v6e:2x2x1
jax: 0.10.0
libtpu: 0.0.40
codegen_flags: <defaults>
</compile_context>

<pallas_src>
import jax
import jax.numpy as jnp
import numpy as np
from jax.experimental import pallas as pl
from jax.experimental.pallas import tpu as pltpu

NEG_SLOPE = 0.01   # F.leaky_relu default negative_slope
NEG_BIG = -1e30


def _fused_gat_kernel(h_all_ref, h_dst_ref, es_ref, adj_ref, wn_ref, attn_ref, out_ref):
    H = es_ref.shape[0]
    F = out_ref.shape[-1]

    x_all = h_all_ref[...]          # (N, n_feat)   all source nodes
    x_dst = h_dst_ref[...]          # (Tr, n_feat)  this tile's destination nodes
    adj = adj_ref[...]              # (Tr, N)       adj[i, j] = 1.0 iff edge src j -> dst i
    mask = adj > 0.0
    wn = wn_ref[...]                # (n_feat, H*F) all heads' fc weights stacked on lanes

    # One MXU matmul gives every head's node projection.
    z_all = jnp.dot(x_all, wn, preferred_element_type=jnp.float32)   # (N,  H*F)
    z_dst = jnp.dot(x_dst, wn, preferred_element_type=jnp.float32)   # (Tr, H*F)

    acc = jnp.zeros(out_ref.shape, jnp.float32)
    inv_heads = jnp.float32(1.0 / H)

    for hd in range(H):             # static unroll, H is small (3)
        z_h = z_all[:, hd * F:(hd + 1) * F]        # (N, F)   source projections
        zd_h = z_dst[:, hd * F:(hd + 1) * F]       # (Tr, F)  destination projections
        att = attn_ref[hd]                         # (3, F) = [a_src ; a_edge ; a_dst]
        a_src = att[0:1, :]                        # (1, F)
        a_dst = att[2:3, :]                        # (1, F)

        # attention logits: source term as a row vector, dest term as a column (MXU).
        s_src = jnp.einsum('of,nf->on', a_src, z_h,
                           preferred_element_type=jnp.float32)        # (1, N)
        s_dst = jnp.einsum('nf,of->no', zd_h, a_dst,
                           preferred_element_type=jnp.float32)        # (Tr, 1)
        score = s_src + es_ref[hd] + s_dst                            # (Tr, N)
        score = jnp.where(score > 0, score, NEG_SLOPE * score)        # leaky_relu

        # masked edge-softmax: select BEFORE exp, exact zeros off-graph.
        masked = jnp.where(mask, score, NEG_BIG)
        m = jnp.max(masked, axis=-1, keepdims=True)                   # (Tr, 1)
        p = jnp.exp(masked - m) * adj                                 # (Tr, N)
        denom = jnp.sum(p, axis=-1, keepdims=True)                    # (Tr, 1)
        denom = jnp.where(denom > 0.0, denom, 1.0)                    # isolated-node guard
        inv = pl.reciprocal(denom, approx=True)                       # EUP reciprocal

        # aggregate messages on the MXU, normalize AFTER aggregation.
        acc = acc + jnp.dot(p, z_h, preferred_element_type=jnp.float32) * inv

    out_ref[...] = (acc * inv_heads).astype(out_ref.dtype)


def multi_head_gat(h, e_dense, adj, wn, we, attn, *, block_rows=None):
    """Dense multi-head EdgeGAT forward.

    h       : (N, n_feat)     node features
    e_dense : (N, N, e_feat)  e_dense[i, j, :] = feature of edge  src j -> dst i
    adj     : (N, N)          adj[i, j] = 1.0 iff edge src j -> dst i exists
    wn      : (H, n_feat, F)  fc weights (x @ wn[h])
    we      : (H, e_feat, F)  fc_edge weights
    attn    : (H, 3, F)       attn_fc weights split into [a_src ; a_edge ; a_dst]
    """
    N, n_feat = h.shape
    H, _, F = wn.shape

    if block_rows is None:
        block_rows = N if N <= 512 else 256      # row tile keeps es block small (v7x VMEM)
    block_rows = min(block_rows, N)
    assert N % block_rows == 0, "N must be divisible by block_rows"
    grid_r = N // block_rows

    # ---- weight folding (head-fused layouts) ----
    wn_flat = jnp.transpose(wn, (1, 0, 2)).reshape(n_feat, H * F)   # x @ wn_flat = [x@Wn_h]_h

    # ---- lane-dense per-head edge scores (removes (N,N,e_feat) from the kernel) ----
    a_edge = attn[:, 1, :]                                          # (H, F)
    v_e = jnp.einsum('hef,hf->he', we, a_edge)                      # (H, e_feat)
    es = jnp.einsum('ije,he->hij', e_dense, v_e)                    # (H, N, N)

    return pl.pallas_call(
        _fused_gat_kernel,
        out_shape=jax.ShapeDtypeStruct((N, F), jnp.float32),
        grid_spec=pltpu.PrefetchScalarGridSpec(
            num_scalar_prefetch=0,
            grid=(grid_r,),
            in_specs=[
                pl.BlockSpec((N, n_feat), lambda r: (0, 0)),            # all source nodes
                pl.BlockSpec((block_rows, n_feat), lambda r: (r, 0)),   # destination tile
                pl.BlockSpec((H, block_rows, N), lambda r: (0, r, 0)),  # edge scores tile
                pl.BlockSpec((block_rows, N), lambda r: (r, 0)),        # adjacency tile
                pl.BlockSpec((n_feat, H * F), lambda r: (0, 0)),        # fused fc weights
                pl.BlockSpec((H, 3, F), lambda r: (0, 0, 0)),           # attention vectors
            ],
            out_specs=pl.BlockSpec((block_rows, F), lambda r: (r, 0)),
        ),
        compiler_params=pltpu.CompilerParams(
            dimension_semantics=("parallel",),     # row tiles are independent (v7x 2-TC)
            vmem_limit_bytes=32 * 1024 * 1024,
        ),
    )(h, h, es, adj, wn_flat, attn)


def reference(h, e_dense, adj, wn, we, attn):
    """Pure-JAX reference of the same multi-head EdgeGAT forward."""
    H = wn.shape[0]
    mask = adj > 0.0
    outs = []
    for hd in range(H):
        z = h @ wn[hd]                                          # (N, F)
        ze = jnp.einsum('ije,ef->ijf', e_dense, we[hd])         # (N, N, F)
        a_src, a_edge, a_dst = attn[hd, 0], attn[hd, 1], attn[hd, 2]
        score = (z @ a_src)[None, :] + ze @ a_edge + (z @ a_dst)[:, None]
        score = jax.nn.leaky_relu(score, NEG_SLOPE)
        masked = jnp.where(mask, score, -jnp.inf)
        alpha = jnp.where(mask, jax.nn.softmax(masked, axis=-1), 0.0)
        outs.append(alpha @ z)
    return jnp.mean(jnp.stack(outs, axis=0), axis=0)


def _xavier(key, shape):
    fan_in, fan_out = shape[-2], shape[-1]
    lim = float(np.sqrt(6.0 / (fan_in + fan_out)))
    return jax.random.uniform(key, shape, jnp.float32, -lim, lim)


if __name__ == "__main__":
    # Small deterministic problem: 16 nodes, 8 node feats, 4 edge feats,
    # out_feat=16, 3 heads (matches `num_heads = 3` in the module file).
    N, n_feat, e_feat, out_feat, H = 16, 8, 4, 16, 3

    key = jax.random.PRNGKey(0)
    k_h, k_e, k_adj, k_wn, k_we, k_a = jax.random.split(key, 6)

    h = jax.random.normal(k_h, (N, n_feat), jnp.float32)
    e_dense = jax.random.normal(k_e, (N, N, e_feat), jnp.float32)

    # random directed graph + self loops (so every node has >= 1 incoming edge)
    adj = (jax.random.uniform(k_adj, (N, N)) < 0.3).astype(jnp.float32)
    adj = jnp.maximum(adj, jnp.eye(N, dtype=jnp.float32))

    # per-head parameters (fc / fc_edge / attn_fc, all bias=False)
    wn = _xavier(k_wn, (H, n_feat, out_feat))
    we = _xavier(k_we, (H, e_feat, out_feat))
    attn = _xavier(k_a, (H, 3, out_feat))

    fn = jax.jit(multi_head_gat)
    out = jax.block_until_ready(fn(h, e_dense, adj, wn, we, attn))

    ref = reference(h, e_dense, adj, wn, we, attn)
    # tolerance loosened slightly for the approximate EUP reciprocal in the softmax
    np.testing.assert_allclose(np.asarray(out), np.asarray(ref), rtol=5e-3, atol=1e-3)
    print("KERNEL_OK")
</pallas_src>

<mosaic_0001>
module attributes {stable_mosaic.version = 11 : i64} {
  func.func @_fused_gat_kernel(%arg0: i32, %arg1: memref<16x8xf32, #tpu.memory_space<vmem>>, %arg2: memref<16x8xf32, #tpu.memory_space<vmem>>, %arg3: memref<3x16x16xf32, #tpu.memory_space<vmem>>, %arg4: memref<16x16xf32, #tpu.memory_space<vmem>>, %arg5: memref<8x48xf32, #tpu.memory_space<vmem>>, %arg6: memref<3x3x16xf32, #tpu.memory_space<vmem>>, %arg7: memref<16x16xf32, #tpu.memory_space<vmem>>) attributes {dimension_semantics = [#tpu.dimension_semantics<parallel>], iteration_bounds = array<i64: 1>, scalar_prefetch = 0 : i64, scratch_operands = 0 : i64, tpu.core_type = #tpu.core_type<tc>, window_params = [{pipeline_mode = #tpu.pipeline_mode<synchronous>, transform_indices = @transform_0, window_bounds = array<i64: 16, 8>}, {transform_indices = @transform_1, window_bounds = array<i64: 16, 8>}, {transform_indices = @transform_2, window_bounds = array<i64: 3, 16, 16>}, {transform_indices = @transform_3, window_bounds = array<i64: 16, 16>}, {pipeline_mode = #tpu.pipeline_mode<synchronous>, transform_indices = @transform_4, window_bounds = array<i64: 8, 48>}, {pipeline_mode = #tpu.pipeline_mode<synchronous>, transform_indices = @transform_5, window_bounds = array<i64: 3, 3, 16>}, {transform_indices = @transform_6, window_bounds = array<i64: 16, 16>}]} {
    %c0 = arith.constant 0 : index
    %c0_0 = arith.constant 0 : index
    %0 = vector.load %arg1[%c0, %c0_0] : memref<16x8xf32, #tpu.memory_space<vmem>>, vector<16x8xf32>
    %c0_1 = arith.constant 0 : index
    %c0_2 = arith.constant 0 : index
    %1 = vector.load %arg2[%c0_1, %c0_2] : memref<16x8xf32, #tpu.memory_space<vmem>>, vector<16x8xf32>
    %c0_3 = arith.constant 0 : index
    %c0_4 = arith.constant 0 : index
    %2 = vector.load %arg4[%c0_3, %c0_4] : memref<16x16xf32, #tpu.memory_space<vmem>>, vector<16x16xf32>
    %cst = arith.constant 0.000000e+00 : f32
    %3 = vector.broadcast %cst : f32 to vector<16x16xf32>
    %4 = arith.cmpf ogt, %2, %3 : vector<16x16xf32>
    %c0_5 = arith.constant 0 : index
    %c0_6 = arith.constant 0 : index
    %5 = vector.load %arg5[%c0_5, %c0_6] : memref<8x48xf32, #tpu.memory_space<vmem>>, vector<8x48xf32>
    %cst_7 = arith.constant dense<0.000000e+00> : vector<16x48xf32>
    %6 = tpu.matmul %0, %5, %cst_7 {dimension_numbers = #tpu.dot_dimension_numbers<[1], [0], [0], [1], [0, 0, 1, 1], [], []>} : vector<16x8xf32>, vector<8x48xf32>, vector<16x48xf32> -> vector<16x48xf32>
    %cst_8 = arith.constant dense<0.000000e+00> : vector<16x48xf32>
    %7 = tpu.matmul %1, %5, %cst_8 {dimension_numbers = #tpu.dot_dimension_numbers<[1], [0], [0], [1], [0, 0, 1, 1], [], []>} : vector<16x8xf32>, vector<8x48xf32>, vector<16x48xf32> -> vector<16x48xf32>
    %cst_9 = arith.constant 0.000000e+00 : f32
    %8 = vector.broadcast %cst_9 : f32 to vector<16x16xf32>
    %9 = vector.extract_strided_slice %6 {offsets = [0, 0], sizes = [16, 16], strides = [1, 1]} : vector<16x48xf32> to vector<16x16xf32>
    %10 = vector.extract_strided_slice %7 {offsets = [0, 0], sizes = [16, 16], strides = [1, 1]} : vector<16x48xf32> to vector<16x16xf32>
    %c0_10 = arith.constant 0 : index
    %c0_11 = arith.constant 0 : index
    %c0_12 = arith.constant 0 : index
    %11 = vector.load %arg6[%c0_10, %c0_11, %c0_12] : memref<3x3x16xf32, #tpu.memory_space<vmem>>, vector<1x3x16xf32>
    %12 = vector.shape_cast %11 : vector<1x3x16xf32> to vector<3x16xf32>
    %13 = vector.extract_strided_slice %12 {offsets = [0, 0], sizes = [1, 16], strides = [1, 1]} : vector<3x16xf32> to vector<1x16xf32>
    %14 = vector.extract_strided_slice %12 {offsets = [2, 0], sizes = [1, 16], strides = [1, 1]} : vector<3x16xf32> to vector<1x16xf32>
    "tpu.trace_start"() <{level = 10 : i32, message = "of,nf->on"}> : () -> ()
    %cst_13 = arith.constant dense<0.000000e+00> : vector<1x16xf32>
    %15 = tpu.matmul %13, %9, %cst_13 {dimension_numbers = #tpu.dot_dimension_numbers<[1], [1], [0], [0], [0, 0, 1, 0], [], []>} : vector<1x16xf32>, vector<16x16xf32>, vector<1x16xf32> -> vector<1x16xf32>
    "tpu.trace_stop"() : () -> ()
    "tpu.trace_start"() <{level = 10 : i32, message = "nf,of->no"}> : () -> ()
    %cst_14 = arith.constant dense<0.000000e+00> : vector<16x1xf32>
    %16 = tpu.matmul %10, %14, %cst_14 {dimension_numbers = #tpu.dot_dimension_numbers<[1], [1], [0], [0], [0, 0, 1, 0], [], []>} : vector<16x16xf32>, vector<1x16xf32>, vector<16x1xf32> -> vector<16x1xf32>
    "tpu.trace_stop"() : () -> ()
    %c0_15 = arith.constant 0 : index
    %c0_16 = arith.constant 0 : index
    %c0_17 = arith.constant 0 : index
    %17 = vector.load %arg3[%c0_15, %c0_16, %c0_17] : memref<3x16x16xf32, #tpu.memory_space<vmem>>, vector<1x16x16xf32>
    %18 = vector.shape_cast %17 : vector<1x16x16xf32> to vector<16x16xf32>
    %19 = vector.broadcast %15 : vector<1x16xf32> to vector<16x16xf32>
    %20 = arith.addf %19, %18 : vector<16x16xf32>
    %21 = vector.broadcast %16 : vector<16x1xf32> to vector<16x16xf32>
    %22 = arith.addf %20, %21 : vector<16x16xf32>
    %cst_18 = arith.constant 0.000000e+00 : f32
    %23 = vector.broadcast %cst_18 : f32 to vector<16x16xf32>
    %24 = arith.cmpf ogt, %22, %23 : vector<16x16xf32>
    %cst_19 = arith.constant 0.00999999977 : f32
    %25 = vector.broadcast %cst_19 : f32 to vector<16x16xf32>
    %26 = arith.mulf %25, %22 : vector<16x16xf32>
    %27 = arith.select %24, %22, %26 : vector<16x16xi1>, vector<16x16xf32>
    %cst_20 = arith.constant -1.000000e+30 : f32
    %28 = vector.broadcast %cst_20 : f32 to vector<16x16xf32>
    %29 = arith.select %4, %27, %28 : vector<16x16xi1>, vector<16x16xf32>
    %cst_21 = arith.constant dense<0xFF800000> : vector<16xf32>
    %30 = vector.multi_reduction <maximumf>, %29, %cst_21 [1] : vector<16x16xf32> to vector<16xf32>
    %31 = vector.shape_cast %30 : vector<16xf32> to vector<16x1xf32>
    %32 = vector.broadcast %31 : vector<16x1xf32> to vector<16x16xf32>
    %33 = arith.subf %29, %32 : vector<16x16xf32>
    %34 = math.exp %33 : vector<16x16xf32>
    %35 = arith.mulf %34, %2 : vector<16x16xf32>
    %cst_22 = arith.constant dense<0.000000e+00> : vector<16xf32>
    %36 = vector.multi_reduction <add>, %35, %cst_22 [1] : vector<16x16xf32> to vector<16xf32>
    %37 = vector.shape_cast %36 : vector<16xf32> to vector<16x1xf32>
    %cst_23 = arith.constant 0.000000e+00 : f32
    %38 = vector.broadcast %cst_23 : f32 to vector<16x1xf32>
    %39 = arith.cmpf ogt, %37, %38 : vector<16x1xf32>
    %cst_24 = arith.constant 1.000000e+00 : f32
    %40 = vector.broadcast %cst_24 : f32 to vector<16x1xf32>
    %41 = arith.select %39, %37, %40 : vector<16x1xi1>, vector<16x1xf32>
    %42 = tpu.reciprocal %41 {approx = true} : vector<16x1xf32> -> vector<16x1xf32>
    %cst_25 = arith.constant dense<0.000000e+00> : vector<16x16xf32>
    %43 = tpu.matmul %35, %9, %cst_25 {dimension_numbers = #tpu.dot_dimension_numbers<[1], [0], [0], [1], [0, 0, 1, 1], [], []>} : vector<16x16xf32>, vector<16x16xf32>, vector<16x16xf32> -> vector<16x16xf32>
    %44 = vector.broadcast %42 : vector<16x1xf32> to vector<16x16xf32>
    %45 = arith.mulf %43, %44 : vector<16x16xf32>
    %46 = arith.addf %8, %45 : vector<16x16xf32>
    %47 = vector.extract_strided_slice %6 {offsets = [0, 16], sizes = [16, 16], strides = [1, 1]} : vector<16x48xf32> to vector<16x16xf32>
    %48 = vector.extract_strided_slice %7 {offsets = [0, 16], sizes = [16, 16], strides = [1, 1]} : vector<16x48xf32> to vector<16x16xf32>
    %c1 = arith.constant 1 : index
    %c0_26 = arith.constant 0 : index
    %c0_27 = arith.constant 0 : index
    %49 = vector.load %arg6[%c1, %c0_26, %c0_27] : memref<3x3x16xf32, #tpu.memory_space<vmem>>, vector<1x3x16xf32>
    %50 = vector.shape_cast %49 : vector<1x3x16xf32> to vector<3x16xf32>
    %51 = vector.extract_strided_slice %50 {offsets = [0, 0], sizes = [1, 16], strides = [1, 1]} : vector<3x16xf32> to vector<1x16xf32>
    %52 = vector.extract_strided_slice %50 {offsets = [2, 0], sizes = [1, 16], strides = [1, 1]} : vector<3x16xf32> to vector<1x16xf32>
    "tpu.trace_start"() <{level = 10 : i32, message = "of,nf->on"}> : () -> ()
    %cst_28 = arith.constant dense<0.000000e+00> : vector<1x16xf32>
    %53 = tpu.matmul %51, %47, %cst_28 {dimension_numbers = #tpu.dot_dimension_numbers<[1], [1], [0], [0], [0, 0, 1, 0], [], []>} : vector<1x16xf32>, vector<16x16xf32>, vector<1x16xf32> -> vector<1x16xf32>
    "tpu.trace_stop"() : () -> ()
    "tpu.trace_start"() <{level = 10 : i32, message = "nf,of->no"}> : () -> ()
    %cst_29 = arith.constant dense<0.000000e+00> : vector<16x1xf32>
    %54 = tpu.matmul %48, %52, %cst_29 {dimension_numbers = #tpu.dot_dimension_numbers<[1], [1], [0], [0], [0, 0, 1, 0], [], []>} : vector<16x16xf32>, vector<1x16xf32>, vector<16x1xf32> -> vector<16x1xf32>
    "tpu.trace_stop"() : () -> ()
    %c1_30 = arith.constant 1 : index
    %c0_31 = arith.constant 0 : index
    %c0_32 = arith.constant 0 : index
    %55 = vector.load %arg3[%c1_30, %c0_31, %c0_32] : memref<3x16x16xf32, #tpu.memory_space<vmem>>, vector<1x16x16xf32>
    %56 = vector.shape_cast %55 : vector<1x16x16xf32> to vector<16x16xf32>
    %57 = vector.broadcast %53 : vector<1x16xf32> to vector<16x16xf32>
    %58 = arith.addf %57, %56 : vector<16x16xf32>
    %59 = vector.broadcast %54 : vector<16x1xf32> to vector<16x16xf32>
    %60 = arith.addf %58, %59 : vector<16x16xf32>
    %cst_33 = arith.constant 0.000000e+00 : f32
    %61 = vector.broadcast %cst_33 : f32 to vector<16x16xf32>
    %62 = arith.cmpf ogt, %60, %61 : vector<16x16xf32>
    %cst_34 = arith.constant 0.00999999977 : f32
    %63 = vector.broadcast %cst_34 : f32 to vector<16x16xf32>
    %64 = arith.mulf %63, %60 : vector<16x16xf32>
    %65 = arith.select %62, %60, %64 : vector<16x16xi1>, vector<16x16xf32>
    %cst_35 = arith.constant -1.000000e+30 : f32
    %66 = vector.broadcast %cst_35 : f32 to vector<16x16xf32>
    %67 = arith.select %4, %65, %66 : vector<16x16xi1>, vector<16x16xf32>
    %cst_36 = arith.constant dense<0xFF800000> : vector<16xf32>
    %68 = vector.multi_reduction <maximumf>, %67, %cst_36 [1] : vector<16x16xf32> to vector<16xf32>
    %69 = vector.shape_cast %68 : vector<16xf32> to vector<16x1xf32>
    %70 = vector.broadcast %69 : vector<16x1xf32> to vector<16x16xf32>
    %71 = arith.subf %67, %70 : vector<16x16xf32>
    %72 = math.exp %71 : vector<16x16xf32>
    %73 = arith.mulf %72, %2 : vector<16x16xf32>
    %cst_37 = arith.constant dense<0.000000e+00> : vector<16xf32>
    %74 = vector.multi_reduction <add>, %73, %cst_37 [1] : vector<16x16xf32> to vector<16xf32>
    %75 = vector.shape_cast %74 : vector<16xf32> to vector<16x1xf32>
    %cst_38 = arith.constant 0.000000e+00 : f32
    %76 = vector.broadcast %cst_38 : f32 to vector<16x1xf32>
    %77 = arith.cmpf ogt, %75, %76 : vector<16x1xf32>
    %cst_39 = arith.constant 1.000000e+00 : f32
    %78 = vector.broadcast %cst_39 : f32 to vector<16x1xf32>
    %79 = arith.select %77, %75, %78 : vector<16x1xi1>, vector<16x1xf32>
    %80 = tpu.reciprocal %79 {approx = true} : vector<16x1xf32> -> vector<16x1xf32>
    %cst_40 = arith.constant dense<0.000000e+00> : vector<16x16xf32>
    %81 = tpu.matmul %73, %47, %cst_40 {dimension_numbers = #tpu.dot_dimension_numbers<[1], [0], [0], [1], [0, 0, 1, 1], [], []>} : vector<16x16xf32>, vector<16x16xf32>, vector<16x16xf32> -> vector<16x16xf32>
    %82 = vector.broadcast %80 : vector<16x1xf32> to vector<16x16xf32>
    %83 = arith.mulf %81, %82 : vector<16x16xf32>
    %84 = arith.addf %46, %83 : vector<16x16xf32>
    %85 = vector.extract_strided_slice %6 {offsets = [0, 32], sizes = [16, 16], strides = [1, 1]} : vector<16x48xf32> to vector<16x16xf32>
    %86 = vector.extract_strided_slice %7 {offsets = [0, 32], sizes = [16, 16], strides = [1, 1]} : vector<16x48xf32> to vector<16x16xf32>
    %c2 = arith.constant 2 : index
    %c0_41 = arith.constant 0 : index
    %c0_42 = arith.constant 0 : index
    %87 = vector.load %arg6[%c2, %c0_41, %c0_42] : memref<3x3x16xf32, #tpu.memory_space<vmem>>, vector<1x3x16xf32>
    %88 = vector.shape_cast %87 : vector<1x3x16xf32> to vector<3x16xf32>
    %89 = vector.extract_strided_slice %88 {offsets = [0, 0], sizes = [1, 16], strides = [1, 1]} : vector<3x16xf32> to vector<1x16xf32>
    %90 = vector.extract_strided_slice %88 {offsets = [2, 0], sizes = [1, 16], strides = [1, 1]} : vector<3x16xf32> to vector<1x16xf32>
    "tpu.trace_start"() <{level = 10 : i32, message = "of,nf->on"}> : () -> ()
    %cst_43 = arith.constant dense<0.000000e+00> : vector<1x16xf32>
    %91 = tpu.matmul %89, %85, %cst_43 {dimension_numbers = #tpu.dot_dimension_numbers<[1], [1], [0], [0], [0, 0, 1, 0], [], []>} : vector<1x16xf32>, vector<16x16xf32>, vector<1x16xf32> -> vector<1x16xf32>
    "tpu.trace_stop"() : () -> ()
    "tpu.trace_start"() <{level = 10 : i32, message = "nf,of->no"}> : () -> ()
    %cst_44 = arith.constant dense<0.000000e+00> : vector<16x1xf32>
    %92 = tpu.matmul %86, %90, %cst_44 {dimension_numbers = #tpu.dot_dimension_numbers<[1], [1], [0], [0], [0, 0, 1, 0], [], []>} : vector<16x16xf32>, vector<1x16xf32>, vector<16x1xf32> -> vector<16x1xf32>
    "tpu.trace_stop"() : () -> ()
    %c2_45 = arith.constant 2 : index
    %c0_46 = arith.constant 0 : index
    %c0_47 = arith.constant 0 : index
    %93 = vector.load %arg3[%c2_45, %c0_46, %c0_47] : memref<3x16x16xf32, #tpu.memory_space<vmem>>, vector<1x16x16xf32>
    %94 = vector.shape_cast %93 : vector<1x16x16xf32> to vector<16x16xf32>
    %95 = vector.broadcast %91 : vector<1x16xf32> to vector<16x16xf32>
    %96 = arith.addf %95, %94 : vector<16x16xf32>
    %97 = vector.broadcast %92 : vector<16x1xf32> to vector<16x16xf32>
    %98 = arith.addf %96, %97 : vector<16x16xf32>
    %cst_48 = arith.constant 0.000000e+00 : f32
    %99 = vector.broadcast %cst_48 : f32 to vector<16x16xf32>
    %100 = arith.cmpf ogt, %98, %99 : vector<16x16xf32>
    %cst_49 = arith.constant 0.00999999977 : f32
    %101 = vector.broadcast %cst_49 : f32 to vector<16x16xf32>
    %102 = arith.mulf %101, %98 : vector<16x16xf32>
    %103 = arith.select %100, %98, %102 : vector<16x16xi1>, vector<16x16xf32>
    %cst_50 = arith.constant -1.000000e+30 : f32
    %104 = vector.broadcast %cst_50 : f32 to vector<16x16xf32>
    %105 = arith.select %4, %103, %104 : vector<16x16xi1>, vector<16x16xf32>
    %cst_51 = arith.constant dense<0xFF800000> : vector<16xf32>
    %106 = vector.multi_reduction <maximumf>, %105, %cst_51 [1] : vector<16x16xf32> to vector<16xf32>
    %107 = vector.shape_cast %106 : vector<16xf32> to vector<16x1xf32>
    %108 = vector.broadcast %107 : vector<16x1xf32> to vector<16x16xf32>
    %109 = arith.subf %105, %108 : vector<16x16xf32>
    %110 = math.exp %109 : vector<16x16xf32>
    %111 = arith.mulf %110, %2 : vector<16x16xf32>
    %cst_52 = arith.constant dense<0.000000e+00> : vector<16xf32>
    %112 = vector.multi_reduction <add>, %111, %cst_52 [1] : vector<16x16xf32> to vector<16xf32>
    %113 = vector.shape_cast %112 : vector<16xf32> to vector<16x1xf32>
    %cst_53 = arith.constant 0.000000e+00 : f32
    %114 = vector.broadcast %cst_53 : f32 to vector<16x1xf32>
    %115 = arith.cmpf ogt, %113, %114 : vector<16x1xf32>
    %cst_54 = arith.constant 1.000000e+00 : f32
    %116 = vector.broadcast %cst_54 : f32 to vector<16x1xf32>
    %117 = arith.select %115, %113, %116 : vector<16x1xi1>, vector<16x1xf32>
    %118 = tpu.reciprocal %117 {approx = true} : vector<16x1xf32> -> vector<16x1xf32>
    %cst_55 = arith.constant dense<0.000000e+00> : vector<16x16xf32>
    %119 = tpu.matmul %111, %85, %cst_55 {dimension_numbers = #tpu.dot_dimension_numbers<[1], [0], [0], [1], [0, 0, 1, 1], [], []>} : vector<16x16xf32>, vector<16x16xf32>, vector<16x16xf32> -> vector<16x16xf32>
    %120 = vector.broadcast %118 : vector<16x1xf32> to vector<16x16xf32>
    %121 = arith.mulf %119, %120 : vector<16x16xf32>
    %122 = arith.addf %84, %121 : vector<16x16xf32>
    %cst_56 = arith.constant 0.333333343 : f32
    %123 = vector.broadcast %cst_56 : f32 to vector<16x16xf32>
    %124 = arith.mulf %122, %123 : vector<16x16xf32>
    %c0_57 = arith.constant 0 : index
    %c0_58 = arith.constant 0 : index
    %125 = vector.load %arg7[%c0_57, %c0_58] : memref<16x16xf32, #tpu.memory_space<vmem>>, vector<16x16xf32>
    tpu.vector_store %arg7[%c0_57, %c0_58], %124 {strides = array<i32>} : memref<16x16xf32, #tpu.memory_space<vmem>>, vector<16x16xf32>,
    return
  }
  func.func @transform_0(%arg0: i32) -> (i32, i32) {
    %c0_i32 = arith.constant 0 : i32
    %c0_i32_0 = arith.constant 0 : i32
    %c0_i32_1 = arith.constant 0 : i32
    return %c0_i32, %c0_i32_0 : i32, i32
  }
  func.func @transform_1(%arg0: i32) -> (i32, i32) {
    %c0_i32 = arith.constant 0 : i32
    %c0_i32_0 = arith.constant 0 : i32
    return %arg0, %c0_i32 : i32, i32
  }
  func.func @transform_2(%arg0: i32) -> (i32, i32, i32) {
    %c0_i32 = arith.constant 0 : i32
    %c0_i32_0 = arith.constant 0 : i32
    %c0_i32_1 = arith.constant 0 : i32
    return %c0_i32, %arg0, %c0_i32_0 : i32, i32, i32
  }
  func.func @transform_3(%arg0: i32) -> (i32, i32) {
    %c0_i32 = arith.constant 0 : i32
    %c0_i32_0 = arith.constant 0 : i32
    return %arg0, %c0_i32 : i32, i32
  }
  func.func @transform_4(%arg0: i32) -> (i32, i32) {
    %c0_i32 = arith.constant 0 : i32
    %c0_i32_0 = arith.constant 0 : i32
    %c0_i32_1 = arith.constant 0 : i32
    return %c0_i32, %c0_i32_0 : i32, i32
  }
  func.func @transform_5(%arg0: i32) -> (i32, i32, i32) {
    %c0_i32 = arith.constant 0 : i32
    %c0_i32_0 = arith.constant 0 : i32
    %c0_i32_1 = arith.constant 0 : i32
    %c0_i32_2 = arith.constant 0 : i32
    return %c0_i32, %c0_i32_0, %c0_i32_1 : i32, i32, i32
  }
  func.func @transform_6(%arg0: i32) -> (i32, i32) {
    %c0_i32 = arith.constant 0 : i32
    %c0_i32_0 = arith.constant 0 : i32
    return %arg0, %c0_i32 : i32, i32
  }
}

</mosaic_0001>

<bundles_post_ra>
// kernel: multi_head_gat.1
= control target key start
LH: loop header
LB: loop body
LE: loop exit
PB: predicated region body
PF: predicated region fallthrough
CT: control target
= control target key end

     0   :  { %vm33_vm0 = vcmask 64512   ;;  %s1303_s0 = inlined_call_operand.vmem [shape: f32[16,8], index: 0, kind: input, shape index: {}, may-alias: {0,1}]   ;;  %s1304_s1 = inlined_call_operand.vmem [shape: f32[16,8], index: 1, kind: input, shape index: {}, may-alias: {0,1}]   ;;  %s1305_s2 = inlined_call_operand.vmem [shape: f32[3,16,16], index: 2, kind: input, shape index: {}]   ;;  %s1306_s3 = inlined_call_operand.vmem [shape: f32[16,16], index: 3, kind: input, shape index: {}]   ;;  %s1307_s4 = inlined_call_operand.vmem [shape: f32[8,48], index: 4, kind: input, shape index: {}]   ;;  %s1308_s5 = inlined_call_operand.vmem [shape: f32[3,3,16], index: 5, kind: input, shape index: {}]   ;;  %s1309_s6 = inlined_call_operand.hbm [shape: f32[16,16], index: 6, kind: output, shape index: {}]  }
   0x1   :  { %v32_v0 = vld [vmem:[%s1307_s4] sm:$0xff]  ;;  %v25_v3 = vld [vmem:[%s1303_s0 + $0x8] sm:$0xff] }
   0x2   :  { %v24_v1 = vld [vmem:[%s1303_s0] sm:$0xff]  ;;  %968 = vmatprep.subr.mxu0 %v32_v0  ;;  %973 = vmatprep.subr.mxu1 %v32_v0  ;;  %v27_v4 = vld [vmem:[%s1304_s1 + $0x8] sm:$0xff] }
   0x3   :  { %v26_v2 = vld [vmem:[%s1304_s1] sm:$0xff] }
   0x4   :  { %11 = vsyncpa [#allocation3], 0  ;;  %969 = vmatpush3.msra.mxu0 %v32_v0  ;;  %970 = vmatprep.mubr.msk.f32.mxu0 %vm33_vm0, %v24_v1  ;;  %v1075_v5 = vmov 0.0   ;;  %vm1076_vm1 = vmmov 0   ;;  %v277_v6 = vlaneseq  ;;  %v196_v9 = vld [vmem:[%s1308_s5] sm:$0x7] }
   0x5   :  { %974 = vmatpush3.msra.mxu1 %v32_v0  ;;  %975 = vmatprep.mubr.msk.f32.mxu1 %vm33_vm0, %v26_v2  ;;  %vm197_vm2 = vcmask 130048   ;;  %s1077_s4 = smov 112   ;;  %v289_v24 = vld [vmem:[%s1305_s2] sm:$0xff]  ;;  %v290_v25 = vld [vmem:[%s1305_s2 + $0x8] sm:$0xff]  ;;  %s1078_s16 = smov 16  }
   0x6   :  { %971 = vmatmul.mubr.msk.f32.vlgmr.msra.gmra.mxu0 %vm33_vm0, %v25_v3  ;;  %976 = vmatmul.mubr.msk.f32.vlgmr.msra.gmra.mxu1 %vm33_vm0, %v27_v4  ;;  %v278_v7 = vshrl.u32 %v277_v6, 7  ;;  %v1180_v30 = vld [vmem:[%s1306_s3] sm:$0xff]  ;;  %v1186_v33 = vld [vmem:[%s1306_s3 + $0x8] sm:$0xff]  ;;  %s1079_s19 = smov 96   ;;  %s1080_s20 = smov 32   ;;  %v930_v6 = vld [vmem:[%s1305_s2 + $0x18] sm:$0xff] }
   0x7   :  { %978 = vmatprep.subr.mxu0 %v1075_v5  ;;  %982 = vmatprep.mubr.msk.f32.mxu0 %vm1076_vm1, %v1075_v5  ;;  %vm30_vm3 = vcmp.gt.f32.partialorder %v1180_v30, 0.0  ;;  %vm31_vm6 = vcmp.gt.f32.partialorder %v1186_v33, 0.0  ;;  %v925_v42 = vld [vmem:[%s1308_s5 + $0x4] sm:$0x7]  ;;  %v1224_v62 = vld [vmem:[%s1308_s5 + $0x8] sm:$0x7] }
   0x8   :  { %v1137_v8 = vsub.s32 2, %v278_v7  ;;  %v1168_v22 = vsub.s32 0, %v278_v7  ;;  %v929_v7 = vld [vmem:[%s1305_s2 + $0x10] sm:$0xff] }
   0xa   :  { %v280_v10 = vrot.slane %v196_v9, %v1137_v8  ;;  %v504_v43 = vrot.slane %v925_v42, %v1137_v8  ;;  %v743_v63 = vrot.slane %v1224_v62, %v1137_v8 }
  0xc6   :  { %v1143_v11 = vpop.f32.mrf.mxu0  ;;  %v1145_v12 = vpop.f32.mrf.mxu1 }
  0xc7   :  { %979 = vmatpush3.xpose.msk.msra.mxu0 %vm197_vm2, %v1143_v11  ;;  %985 = vmatprep.subr.mxu1 %v1143_v11  ;;  %v282_v16 = vmul.f32 %v1145_v12, %v280_v10 }
  0xc8   :  { %v1150_v13 = vpop.f32.mrf.mxu0  ;;  %v1152_v14 = vpop.f32.mrf.mxu1  ;;  %986 = vmatpush3.msra.mxu1 %v1143_v11  ;;  %980 = vmatprep.subr.mxu0 %v1075_v5 }
  0xc9   :  { %987 = vmatprep.subr.mxu1 %v1150_v13  ;;  %v281_v15 = vmul.f32 %v280_v10, %v1152_v14  ;;  %v286_v18 = vsel %vm197_vm2, %v282_v16, 0.0 }
  0xca   :  { %988 = vmatpush3.msra.mxu1 %v1150_v13 }
  0xcb   :  { %981 = vmatpush3.xpose.msk.msra.mxu0 %vm197_vm2, %v1150_v13  ;;  %v283_v17 = vsel %vm197_vm2, %v281_v15, 0.0  ;;  %992 = vmatprep.subr.mxu1 %v1075_v5 }
  0xcc   :  { %284 = vadd.xlane.f32.xlu0 %v283_v17 }
  0xce   :  { %983 = vmatmul.mubr.msk.f32.vlgmr.msra.gmra.mxu0 %vm197_vm2, %v196_v9 }
  0xd0   :  { %287 = vadd.xlane.f32.xlu0 %v286_v18 }
  0xe6   :  { %422 = vrot.lane.b32.xlu0 %v1143_v11, %s1077_s4 }
 0x155   :  { %v285_v19 = vpop.xlane.xlu0 %284 }
 0x159   :  { %v288_v20 = vpop.xlane.xlu0 %287 }
 0x15d   :  { %v423_v21 = vpop.permute.xlu0 %422 }
 0x15e   :  { %999 = vmatprep.subr.mxu0 %v423_v21 }
 0x15f   :  { %1000 = vmatpush3.msra.mxu0 %v423_v21 }
 0x18e   :  { %v273_v23 = vpop.f32.mrf.mxu0 }
 0x18f   :  { %v294_v26 = vrot.slane %v273_v23, %v1168_v22 }
 0x190   :  { %v984_v27 = vpop.f32.mrf.mxu0 }
 0x191   :  { %v295_v28 = vadd.f32 %v294_v26, %v289_v24  ;;  %v296_v29 = vadd.f32 %v294_v26, %v290_v25 }
 0x193   :  { %v297_v31 = vadd.f32 %v295_v28, %v285_v19  ;;  %v298_v32 = vadd.f32 %v296_v29, %v288_v20 }
 0x195   :  { %vm299_vm4 = vcmp.gt.f32.partialorder %v297_v31, 0.0  ;;  %v301_v34 = vmul.f32 0.01, %v297_v31  ;;  %vm300_vm5 = vcmp.gt.f32.partialorder %v298_v32, 0.0  ;;  %v302_v35 = vmul.f32 0.01, %v298_v32 }
 0x197   :  { %v303_v36 = vsel %vm299_vm4, %v297_v31, %v301_v34  ;;  %v304_v37 = vsel %vm300_vm5, %v298_v32, %v302_v35 }
 0x198   :  { %v305_v38 = vsel %vm30_vm3, %v303_v36, -1e+30  ;;  %v306_v40 = vsel %vm31_vm6, %v304_v37, -1e+30 }
 0x199   :  { %v307_v39 = vsel %vm197_vm2, %v305_v38, -inf  ;;  %v310_v41 = vsel %vm197_vm2, %v306_v40, -inf }
 0x19a   :  { %308 = vmax.xlane.f32.xlu1 %v307_v39 }
 0x19e   :  { %311 = vmax.xlane.f32.xlu1 %v310_v41 }
 0x1af   :  { %420 = vrot.lane.b32.xlu1 %v1150_v13, %s1077_s4 }
 0x1b3   :  { %506 = vrot.lane.b32.xlu1 %v504_v43, %s1078_s16 }
 0x223   :  { %v309_v44 = vpop.xlane.xlu1 %308 }
 0x224   :  { %v313_v45 = vsub.f32 %v305_v38, %v309_v44 }
 0x226   :  { %v315_v46 = vmul.f32 1.442695, %v313_v45 }
 0x227   :  { %v312_v47 = vpop.xlane.xlu1 %311 }
 0x228   :  { %1029 = vpow2.f32 %v315_v46  ;;  %v314_v48 = vsub.f32 %v306_v40, %v312_v47 }
 0x22a   :  { %v317_v49 = vmul.f32 1.442695, %v314_v48 }
 0x22b   :  { %v421_v50 = vpop.permute.xlu1 %420 }
 0x22c   :  { %1031 = vpow2.f32 %v317_v49  ;;  %1001 = vmatprep.subr.mxu0 %v421_v50  ;;  %v937_v49 = vld [vmem:[%s1305_s2 + $0x20] sm:$0xff] }
 0x22d   :  { %1002 = vmatpush3.msra.mxu0 %v421_v50 }
 0x22e   :  { %1006 = vmatprep.subr.mxu0 %v1075_v5 }
 0x22f   :  { %v507_v51 = vpop.permute.xlu1 %506 }
 0x230   :  { %v509_v52 = vmul.f32 %v507_v51, %v1152_v14  ;;  %v510_v53 = vmul.f32 %v1145_v12, %v507_v51 }
 0x232   :  { %515 = vrot.lane.b32.xlu0 %v510_v53, %s1077_s4  ;;  %513 = vrot.lane.b32.xlu1 %v509_v52, %s1077_s4 }
 0x235   :  { %v1030_v54 = vpop.eup %1029 }
 0x236   :  { %v1207_v55 = vmul.f32 %v1030_v54, %v1180_v30 }
 0x238   :  { %989 = vmatprep.mubr.msk.f32.mxu1 %vm197_vm2, %v1207_v55 }
 0x239   :  { %v1032_v56 = vpop.eup %1031 }
 0x23a   :  { %v320_v57 = vmul.f32 %v1032_v56, %v1186_v33 }
 0x23c   :  { %990 = vmatmul.mubr.msk.f32.vlgmr.msra.gmra.mxu1 %vm197_vm2, %v320_v57 }
 0x23d   :  { %993 = vmatpush3.xpose.msk.msra.mxu1 %vm197_vm2, %v423_v21  ;;  %996 = vmatprep.mubr.msk.f32.mxu1 %vm1076_vm1, %v1075_v5 }
 0x23e   :  { %994 = vmatprep.subr.mxu1 %v1075_v5 }
 0x241   :  { %995 = vmatpush3.xpose.msk.msra.mxu1 %vm197_vm2, %v421_v50  ;;  %v938_v50 = vld [vmem:[%s1305_s2 + $0x28] sm:$0xff]  ;;  %s1081_s2 = smov [#allocation2]  }
 0x242   :  { %s905_s28 = sshll.u32 %s1081_s2, 4  ;;  %s906_s28 = int_to_ptr.vmem [resolvable:$true] %s905_s28 }
 0x243   :  { %s1053_s29 = scalar_lea.vmem %s906_s28, 256  ;;  %p1058_p1 = scmp.lt.s32.totalorder %s906_s28, %s906_s28 }
 0x244   :  { %997 = vmatmul.mubr.msk.f32.vlgmr.msra.gmra.mxu1 %vm197_vm2, %v925_v42  ;;  %p1054_p0 = scmp.ne.s32.totalorder %s906_s28, %s1053_s29  ;;  %p1059_p2 = scmp.lt.s32.totalorder %s1053_s29, %s1053_s29 }
 0x246   :  { %p1060_p3 = por %p1059_p2, %p1058_p1 }
 0x248   :  { %p1061_p4 = pnand %p1060_p3, %p1054_p0 }
 0x2a4   :  { %v516_v58 = vpop.permute.xlu0 %515  ;;  %v514_v59 = vpop.permute.xlu1 %513 }
 0x2a5   :  { %v522_v60 = vsel %vm197_vm2, %v516_v58, 0.0  ;;  %v519_v61 = vsel %vm197_vm2, %v514_v59, 0.0 }
 0x2a6   :  { %523 = vadd.xlane.f32.xlu0 %v522_v60  ;;  %520 = vadd.xlane.f32.xlu1 %v519_v61 }
 0x2b7   :  { %661 = vrot.lane.b32.xlu1 %v1143_v11, %s1079_s19 }
 0x2bb   :  { %745 = vrot.lane.b32.xlu1 %v743_v63, %s1080_s20 }
 0x2fc   :  { %v1230_v0 = vpop.f32.mrf.mxu1 }
 0x2fe   :  { %v1232_v1 = vpop.f32.mrf.mxu1 }
 0x304   :  { %v497_v2 = vpop.f32.mrf.mxu1 }
 0x305   :  { %v531_v4 = vrot.slane %v497_v2, %v1168_v22 }
 0x306   :  { %v998_v3 = vpop.f32.mrf.mxu1 }
 0x307   :  { %v533_v9 = vadd.f32 %v930_v6, %v531_v4  ;;  %v532_v8 = vadd.f32 %v929_v7, %v531_v4  ;;  %v321_v4 = vsel %vm197_vm2, %v1207_v55, 0.0 }
 0x32f   :  { %v524_v10 = vpop.xlane.xlu0 %523  ;;  %v521_v11 = vpop.xlane.xlu1 %520 }
 0x330   :  { %v535_v15 = vadd.f32 %v533_v9, %v524_v10  ;;  %v534_v16 = vadd.f32 %v532_v8, %v521_v11 }
 0x332   :  { %v539_v17 = vmul.f32 0.01, %v535_v15  ;;  %v538_v18 = vmul.f32 0.01, %v534_v16  ;;  %vm536_vm7 = vcmp.gt.f32.partialorder %v534_v16, 0.0  ;;  %vm537_vm8 = vcmp.gt.f32.partialorder %v535_v15, 0.0 }
 0x333   :  { %v662_v19 = vpop.permute.xlu1 %661 }
 0x334   :  { %1013 = vmatprep.subr.mxu1 %v662_v19  ;;  %v540_v20 = vsel %vm536_vm7, %v534_v16, %v538_v18  ;;  %v541_v21 = vsel %vm537_vm8, %v535_v15, %v539_v17 }
 0x335   :  { %1014 = vmatpush3.msra.mxu1 %v662_v19  ;;  %v542_v23 = vsel %vm30_vm3, %v540_v20, -1e+30  ;;  %v543_v26 = vsel %vm31_vm6, %v541_v21, -1e+30 }
 0x336   :  { %v544_v24 = vsel %vm197_vm2, %v542_v23, -inf  ;;  %v547_v28 = vsel %vm197_vm2, %v543_v26, -inf }
 0x337   :  { %545 = vmax.xlane.f32.xlu0 %v544_v24  ;;  %v746_v25 = vpop.permute.xlu1 %745 }
 0x338   :  { %v748_v27 = vmul.f32 %v746_v25, %v1152_v14  ;;  %v749_v29 = vmul.f32 %v1145_v12, %v746_v25  ;;  %v324_v14 = vsel %vm197_vm2, %v320_v57, 0.0 }
 0x33a   :  { %752 = vrot.lane.b32.xlu1 %v748_v27, %s1079_s19 }
 0x33b   :  { %548 = vmax.xlane.f32.xlu0 %v547_v28 }
 0x33e   :  { %754 = vrot.lane.b32.xlu1 %v749_v29, %s1079_s19 }
 0x351   :  { %659 = vrot.lane.b32.xlu0 %v1150_v13, %s1079_s19 }
 0x3ac   :  { %v753_v31 = vpop.permute.xlu1 %752 }
 0x3ad   :  { %v758_v32 = vsel %vm197_vm2, %v753_v31, 0.0 }
 0x3ae   :  { %759 = vadd.xlane.f32.xlu0 %v758_v32 }
 0x3b0   :  { %v755_v34 = vpop.permute.xlu1 %754 }
 0x3b1   :  { %v761_v35 = vsel %vm197_vm2, %v755_v34, 0.0 }
 0x3b2   :  { %762 = vadd.xlane.f32.xlu1 %v761_v35 }
 0x3b6   :  { %325 = vadd.xlane.f32.xlu1 %v324_v14 }
 0x3c0   :  { %v546_v36 = vpop.xlane.xlu0 %545 }
 0x3c1   :  { %v550_v37 = vsub.f32 %v542_v23, %v546_v36 }
 0x3c3   :  { %v552_v38 = vmul.f32 1.442695, %v550_v37 }
 0x3c4   :  { %v549_v12 = vpop.xlane.xlu0 %548 }
 0x3c5   :  { %1033 = vpow2.f32 %v552_v38  ;;  %v551_v39 = vsub.f32 %v543_v26, %v549_v12 }
 0x3c7   :  { %v554_v40 = vmul.f32 1.442695, %v551_v39 }
 0x3c8   :  { %v660_v41 = vpop.permute.xlu0 %659 }
 0x3c9   :  { %1035 = vpow2.f32 %v554_v40  ;;  %1015 = vmatprep.subr.mxu1 %v660_v41 }
 0x3ca   :  { %1016 = vmatpush3.msra.mxu1 %v660_v41 }
 0x3d2   :  { %v1034_v13 = vpop.eup %1033 }
 0x3d3   :  { %v556_v42 = vmul.f32 %v1034_v13, %v1180_v30 }
 0x3d5   :  { %1003 = vmatprep.mubr.msk.f32.mxu0 %vm197_vm2, %v556_v42  ;;  %v558_v6 = vsel %vm197_vm2, %v556_v42, 0.0 }
 0x3d6   :  { %v1036_v43 = vpop.eup %1035 }
 0x3d7   :  { %v557_v44 = vmul.f32 %v1036_v43, %v1186_v33 }
 0x3d9   :  { %1004 = vmatmul.mubr.msk.f32.vlgmr.msra.gmra.mxu0 %vm197_vm2, %v557_v44  ;;  %v561_v45 = vsel %vm197_vm2, %v557_v44, 0.0 }
 0x3da   :  { %1007 = vmatpush3.xpose.msk.msra.mxu0 %vm197_vm2, %v662_v19  ;;  %562 = vadd.xlane.f32.xlu1 %v561_v45 }
 0x3db   :  { %1008 = vmatprep.subr.mxu0 %v1075_v5  ;;  %1010 = vmatprep.mubr.msk.f32.mxu0 %vm1076_vm1, %v1075_v5 }
 0x3de   :  { %1009 = vmatpush3.xpose.msk.msra.mxu0 %vm197_vm2, %v660_v41 }
 0x3e1   :  { %1011 = vmatmul.mubr.msk.f32.vlgmr.msra.gmra.mxu0 %vm197_vm2, %v1224_v62 }
 0x437   :  { %v760_v54 = vpop.xlane.xlu0 %759 }
 0x43b   :  { %v763_v56 = vpop.xlane.xlu1 %762 }
 0x43f   :  { %v326_v23 = vpop.xlane.xlu1 %325 }
 0x440   :  { %vm328_vm11 = vcmp.gt.f32.partialorder %v326_v23, 0.0 }
 0x463   :  { %v563_v24 = vpop.xlane.xlu1 %562 }
 0x464   :  { %vm565_vm12 = vcmp.gt.f32.partialorder %v563_v24, 0.0 }
 0x465   :  { %v567_v27 = vsel %vm565_vm12, %v563_v24, 1.0 }
 0x499   :  { %v1268_v46 = vpop.f32.mrf.mxu0 }
 0x49b   :  { %v1270_v47 = vpop.f32.mrf.mxu0 }
 0x4a1   :  { %v736_v48 = vpop.f32.mrf.mxu0 }
 0x4a2   :  { %v770_v5 = vrot.slane %v736_v48, %v1168_v22 }
 0x4a3   :  { %v1012_v51 = vpop.f32.mrf.mxu0 }
 0x4a4   :  { %v771_v52 = vadd.f32 %v937_v49, %v770_v5  ;;  %v772_v53 = vadd.f32 %v938_v50, %v770_v5 }
 0x4a6   :  { %v773_v57 = vadd.f32 %v771_v52, %v760_v54  ;;  %v774_v58 = vadd.f32 %v772_v53, %v763_v56 }
 0x4a8   :  { %vm775_vm9 = vcmp.gt.f32.partialorder %v773_v57, 0.0  ;;  %v777_v59 = vmul.f32 0.01, %v773_v57  ;;  %vm776_vm10 = vcmp.gt.f32.partialorder %v774_v58, 0.0  ;;  %v778_v60 = vmul.f32 0.01, %v774_v58 }
 0x4aa   :  { %v779_v61 = vsel %vm775_vm9, %v773_v57, %v777_v59  ;;  %v780_v62 = vsel %vm776_vm10, %v774_v58, %v778_v60 }
 0x4ab   :  { %v781_v63 = vsel %vm30_vm3, %v779_v61, -1e+30  ;;  %v782_v22 = vsel %vm31_vm6, %v780_v62, -1e+30 }
 0x4ac   :  { %v783_v2 = vsel %vm197_vm2, %v781_v63, -inf  ;;  %v786_v3 = vsel %vm197_vm2, %v782_v22, -inf }
 0x4ad   :  { %784 = vmax.xlane.f32.xlu0 %v783_v2 }
 0x4b1   :  { %787 = vmax.xlane.f32.xlu0 %v786_v3 }
 0x4b5   :  { %322 = vadd.xlane.f32.xlu0 %v321_v4 }
 0x4b9   :  { %559 = vadd.xlane.f32.xlu0 %v558_v6 }
 0x536   :  { %v785_v7 = vpop.xlane.xlu0 %784 }
 0x537   :  { %v789_v9 = vsub.f32 %v781_v63, %v785_v7 }
 0x539   :  { %v791_v8 = vmul.f32 1.442695, %v789_v9 }
 0x53a   :  { %v788_v10 = vpop.xlane.xlu0 %787 }
 0x53b   :  { %1037 = vpow2.f32 %v791_v8  ;;  %v790_v11 = vsub.f32 %v782_v22, %v788_v10 }
 0x53d   :  { %v793_v15 = vmul.f32 1.442695, %v790_v11 }
 0x53e   :  { %v323_v21 = vpop.xlane.xlu0 %322 }
 0x53f   :  { %1039 = vpow2.f32 %v793_v15  ;;  %vm327_vm14 = vcmp.gt.f32.partialorder %v323_v21, 0.0 }
 0x542   :  { %v560_v25 = vpop.xlane.xlu0 %559 }
 0x543   :  { %vm564_vm13 = vcmp.gt.f32.partialorder %v560_v25, 0.0 }
 0x544   :  { %v566_v28 = vsel %vm564_vm13, %v560_v25, 1.0 }
 0x548   :  { %v1038_v16 = vpop.eup %1037 }
 0x549   :  { %v795_v17 = vmul.f32 %v1038_v16, %v1180_v30  ;;  %v330_v30 = vsel %vm328_vm11, %v326_v23, 1.0 }
 0x54a   :  { %1041 = vrcp.f32 %v330_v30 }
 0x54b   :  { %1017 = vmatprep.mubr.msk.f32.mxu1 %vm197_vm2, %v795_v17  ;;  %v797_v18 = vsel %vm197_vm2, %v795_v17, 0.0  ;;  %1043 = vrcp.f32 %v567_v27 }
 0x54c   :  { %v1040_v55 = vpop.eup %1039  ;;  %798 = vadd.xlane.f32.xlu0 %v797_v18  ;;  %1045 = vrcp.f32 %v566_v28 }
 0x54d   :  { %v796_v19 = vmul.f32 %v1040_v55, %v1186_v33  ;;  %v329_v33 = vsel %vm327_vm14, %v323_v21, 1.0 }
 0x54e   :  { %1047 = vrcp.f32 %v329_v33 }
 0x54f   :  { %1018 = vmatmul.mubr.msk.f32.vlgmr.msra.gmra.mxu1 %vm197_vm2, %v796_v19  ;;  %v800_v20 = vsel %vm197_vm2, %v796_v19, 0.0 }
 0x550   :  { %801 = vadd.xlane.f32.xlu1 %v800_v20 }
 0x557   :  { %v1042_v34 = vpop.eup %1041 }
 0x558   :  { %v1044_v35 = vpop.eup %1043  ;;  %v415_v38 = vmul.f32 %v1042_v34, %v1230_v0 }
 0x559   :  { %v1046_v14 = vpop.eup %1045  ;;  %v654_v36 = vmul.f32 %v1044_v35, %v1268_v46 }
 0x55a   :  { %v653_v12 = vmul.f32 %v1046_v14, %v1270_v47 }
 0x55b   :  { %v1048_v37 = vpop.eup %1047  ;;  %v656_v41 = vadd.f32 %v654_v36, %v415_v38 }
 0x55c   :  { %v414_v42 = vmul.f32 %v1048_v37, %v1232_v1 }
 0x55e   :  { %v655_v48 = vadd.f32 %v653_v12, %v414_v42 }
 0x5d5   :  { %v799_v29 = vpop.xlane.xlu0 %798 }
 0x5d6   :  { %vm803_vm0 = vcmp.gt.f32.partialorder %v799_v29, 0.0 }
 0x5d7   :  { %v805_v32 = vsel %vm803_vm0, %v799_v29, 1.0 }
 0x5d9   :  { %v802_v26 = vpop.xlane.xlu1 %801 }
 0x5da   :  { %vm804_vm15 = vcmp.gt.f32.partialorder %v802_v26, 0.0 }
 0x5db   :  { %v806_v31 = vsel %vm804_vm15, %v802_v26, 1.0 }
 0x5dc   :  { %1049 = vrcp.f32 %v806_v31 }
 0x5dd   :  { %1051 = vrcp.f32 %v805_v32 }
 0x5e9   :  { %v1050_v39 = vpop.eup %1049 }
 0x5ea   :  { %v1052_v43 = vpop.eup %1051 }
 0x60f   :  { %v1019_v40 = vpop.f32.mrf.mxu1 }
 0x610   :  { %v893_v13 = vmul.f32 %v1050_v39, %v1019_v40 }
 0x611   :  { %v883_v44 = vpop.f32.mrf.mxu1 }
 0x612   :  { %v895_v45 = vadd.f32 %v893_v13, %v656_v41  ;;  %v892_v49 = vmul.f32 %v1052_v43, %v883_v44 }
 0x614   :  { %v897_v50 = vmul.f32 0.33333334, %v895_v45  ;;  %v894_v46 = vadd.f32 %v892_v49, %v655_v48 }
 0x616   :  { %899 = vst.msk [vmem:[#allocation2 + $0x8] sm:$0xff] %vm197_vm2, %v897_v50  ;;  %v896_v0 = vmul.f32 0.33333334, %v894_v46 }
 0x618   :  { %898 = vst.msk [vmem:[#allocation2] sm:$0xff] %vm197_vm2, %v896_v0 }
 0x619   :  { %1064 = shalt.err (!%p1061_p4)
}
 0x61a   :  { %s1082_s30 = smov 128   ;;  %s1083_s0 = smov 8  }
 0x61b   :  { %911 = dma.vmem_to_hbm [thread:$0]  %s906_s28, 256, %s1309_s6, [#allocation3], %s1082_s30, %s1082_s30, %s1083_s0  }
 0x61c   :  { %1073 = dma.done.wait [#allocation3], 256  }
 0x61d   :  { %1074 = vsyncadd [#allocation3], 4294967040 }
 0x61e   :  { %915 = vsyncpa [#allocation3], 1 }

</bundles_post_ra>
